<compile_context>
chip_gen: v7x
topology: tpu7x:2x2x1
jax: 0.10.0
libtpu: 0.0.40
codegen_flags: <defaults>
</compile_context>

<pallas_src>
import jax
import jax.numpy as jnp
from jax.experimental import pallas as pl
from jax.experimental.pallas import tpu as pltpu

# Layer sizes straight from the PyTorch module.
LAYER_DIMS = [69, 128, 128, 128, 128, 128, 128, 128, 64, 3]
NUM_LAYERS = len(LAYER_DIMS) - 1  # 9 linear layers
PAD = 128                         # lane-aligned feature padding
TB_MAX = 4096                     # max batch-tile rows (~3 MiB of buffers; fits VMEM)


def _round_up(n: int, m: int) -> int:
    return ((n + m - 1) // m) * m


def _has_bf16_vpu() -> bool:
    """v6e/v7x have a native bf16 VPU path; v5e and older do not."""
    try:
        kind = jax.devices()[0].device_kind.lower()
    except Exception:
        return False
    return not any(t in kind for t in ("v2", "v3", "v4", "v5"))


# Epilogue (bias add + ReLU) precision: bf16 on v6e/v7x, f32 on v5e and older.
EPILOGUE_DTYPE = jnp.bfloat16 if _has_bf16_vpu() else jnp.float32


def mlp_kernel(x_ref, w_ref, b_ref, out_ref):
    """Fused MLP on one batch tile: 9 x (bf16 matmul, f32 acc, bias, ReLU)."""
    h = x_ref[...]                                    # (TB, 128) bf16
    for i in range(NUM_LAYERS):                       # fully unrolled, static indexing
        acc = jnp.dot(h, w_ref[i], preferred_element_type=jnp.float32)
        a = acc.astype(b_ref.dtype) + b_ref[i]        # epilogue dtype == bias dtype
        if i < NUM_LAYERS - 1:
            h = jnp.maximum(a, 0.0).astype(jnp.bfloat16)   # ReLU, back to bf16 for MXU
        else:
            out_ref[...] = a.astype(out_ref.dtype)         # bf16 writeback


def init_params(key):
    """Deterministic init mimicking PyTorch Linear default (U[-1/sqrt(fan_in), ..])."""
    weights, biases = [], []
    for i in range(NUM_LAYERS):
        fan_in, fan_out = LAYER_DIMS[i], LAYER_DIMS[i + 1]
        key, kw, kb = jax.random.split(key, 3)
        bound = 1.0 / (fan_in ** 0.5)
        # Stored already transposed: (in, out), matching x @ W convention.
        w = jax.random.uniform(kw, (fan_in, fan_out), jnp.float32, -bound, bound)
        b = jax.random.uniform(kb, (fan_out,), jnp.float32, -bound, bound)
        weights.append(w)
        biases.append(b)
    return weights, biases


def pack_params(weights, biases, bias_dtype=EPILOGUE_DTYPE):
    """One-time host-side prep: pad each layer to 128x128, stack, cast."""
    w_stack, b_stack = [], []
    for w, b in zip(weights, biases):
        fi, fo = w.shape
        w_stack.append(jnp.pad(w, ((0, PAD - fi), (0, PAD - fo))))
        b_stack.append(jnp.pad(b, (0, PAD - fo)).reshape(1, PAD))
    w_stack = jnp.stack(w_stack).astype(jnp.bfloat16)   # (9, 128, 128) bf16
    b_stack = jnp.stack(b_stack).astype(bias_dtype)     # (9, 1, 128)  bf16 or f32
    return w_stack, b_stack


def _choose_batch_tiling(B: int):
    """Minimal-padding tile choice; even #tiles for megacore once B >= 32."""
    ntiles = max(1, -(-B // TB_MAX))        # ceil(B / TB_MAX)
    if B >= 32:
        ntiles = max(ntiles, 2)             # keep both v7x TCs busy
        if ntiles % 2:
            ntiles += 1                     # balanced megacore split
    tb = _round_up(-(-B // ntiles), 16)     # ceil(B/ntiles), bf16 sublane-packed
    return tb, ntiles * tb                  # (tile rows, padded batch)


@jax.jit
def mlp_forward(x, w_stack, b_stack):
    """x: (B, 69) float32 -> (B, 3) float32. w_stack/b_stack from pack_params."""
    B = x.shape[0]
    tb, b_pad = _choose_batch_tiling(B)
    grid = (b_pad // tb,)

    # Pad features 69 -> 128, batch B -> b_pad; cast activations to bf16.
    # (single XLA fusion: one read of x, one write of x_pad)
    x_pad = jnp.pad(x, ((0, b_pad - B), (0, PAD - LAYER_DIMS[0]))).astype(jnp.bfloat16)

    flops = 2 * b_pad * NUM_LAYERS * PAD * PAD
    bytes_accessed = (b_pad * PAD * 2                                 # x in (bf16)
                      + NUM_LAYERS * PAD * PAD * 2                    # weights (bf16)
                      + NUM_LAYERS * PAD * b_stack.dtype.itemsize     # biases
                      + b_pad * PAD * 2)                              # out (bf16)

    out_padded = pl.pallas_call(
        mlp_kernel,
        out_shape=jax.ShapeDtypeStruct((b_pad, PAD), jnp.bfloat16),
        grid_spec=pltpu.PrefetchScalarGridSpec(
            num_scalar_prefetch=0,
            grid=grid,
            in_specs=[
                # Batch tile of activations: streams + double-buffers per step.
                pl.BlockSpec((tb, PAD), lambda i: (i, 0)),
                # Stacked weights/biases: same block every step -> VMEM-resident.
                pl.BlockSpec((NUM_LAYERS, PAD, PAD), lambda i: (0, 0, 0)),
                pl.BlockSpec((NUM_LAYERS, 1, PAD), lambda i: (0, 0, 0)),
            ],
            out_specs=pl.BlockSpec((tb, PAD), lambda i: (i, 0)),
        ),
        compiler_params=pltpu.CompilerParams(
            dimension_semantics=("parallel",),    # shard batch tiles over TCs
            vmem_limit_bytes=32 * 1024 * 1024,    # headroom above v5e's 16 MiB default
        ),
        cost_estimate=pl.CostEstimate(
            flops=flops, transcendentals=0, bytes_accessed=bytes_accessed),
    )(x_pad, w_stack, b_stack)

    # Slice the 3 real logits and upcast once in the wrapper.
    return out_padded[:B, :LAYER_DIMS[-1]].astype(jnp.float32)


def mlp_reference(x, weights, biases):
    """Pure f32 reference of the PyTorch forward."""
    h = x
    for i, (w, b) in enumerate(zip(weights, biases)):
        h = h @ w + b
        if i < NUM_LAYERS - 1:
            h = jnp.maximum(h, 0.0)
    return h


if __name__ == "__main__":
    key = jax.random.PRNGKey(0)
    key, kx = jax.random.split(key)

    weights, biases = init_params(key)
    w_stack, b_stack = pack_params(weights, biases)   # one-time host-side prep

    # Small, module-consistent test batch (single tile, grid=(1,)).
    B = 8
    x = jax.random.normal(kx, (B, LAYER_DIMS[0]), jnp.float32)
    out = jax.block_until_ready(mlp_forward(x, w_stack, b_stack))
    ref = mlp_reference(x, weights, biases)
    assert out.shape == (B, 3), out.shape
    # bf16 matmul operands / bf16 writeback -> loosened tolerance vs f32 reference.
    assert jnp.allclose(out, ref, atol=5e-2, rtol=5e-2), "mismatch vs reference (B=8)"

    # Secondary check: batch not a multiple of the tile, exercises pad + 2-step grid.
    B2 = 100
    key, kx2 = jax.random.split(key)
    x2 = jax.random.normal(kx2, (B2, LAYER_DIMS[0]), jnp.float32)
    out2 = jax.block_until_ready(mlp_forward(x2, w_stack, b_stack))
    ref2 = mlp_reference(x2, weights, biases)
    assert out2.shape == (B2, 3), out2.shape
    assert jnp.allclose(out2, ref2, atol=5e-2, rtol=5e-2), "mismatch vs reference (B=100)"

    print("KERNEL_OK")
</pallas_src>

<mosaic_0001>
module attributes {stable_mosaic.version = 11 : i64} {
  func.func @mlp_kernel(%arg0: i32, %arg1: memref<16x128xbf16, #tpu.memory_space<vmem>>, %arg2: memref<9x128x128xbf16, #tpu.memory_space<vmem>>, %arg3: memref<9x1x128xbf16, #tpu.memory_space<vmem>>, %arg4: memref<16x128xbf16, #tpu.memory_space<vmem>>) attributes {dimension_semantics = [#tpu.dimension_semantics<parallel>], iteration_bounds = array<i64: 1>, scalar_prefetch = 0 : i64, scratch_operands = 0 : i64, tpu.core_type = #tpu.core_type<tc>, window_params = [{transform_indices = @transform_0, window_bounds = array<i64: 16, 128>}, {pipeline_mode = #tpu.pipeline_mode<synchronous>, transform_indices = @transform_1, window_bounds = array<i64: 9, 128, 128>}, {pipeline_mode = #tpu.pipeline_mode<synchronous>, transform_indices = @transform_2, window_bounds = array<i64: 9, 1, 128>}, {transform_indices = @transform_3, window_bounds = array<i64: 16, 128>}]} {
    %c0 = arith.constant 0 : index
    %c0_0 = arith.constant 0 : index
    %0 = vector.load %arg1[%c0, %c0_0] : memref<16x128xbf16, #tpu.memory_space<vmem>>, vector<16x128xbf16>
    %c0_1 = arith.constant 0 : index
    %c0_2 = arith.constant 0 : index
    %c0_3 = arith.constant 0 : index
    %1 = vector.load %arg2[%c0_1, %c0_2, %c0_3] : memref<9x128x128xbf16, #tpu.memory_space<vmem>>, vector<1x128x128xbf16>
    %2 = vector.shape_cast %1 : vector<1x128x128xbf16> to vector<128x128xbf16>
    %cst = arith.constant dense<0.000000e+00> : vector<16x128xf32>
    %3 = tpu.matmul %0, %2, %cst {dimension_numbers = #tpu.dot_dimension_numbers<[1], [0], [0], [1], [0, 0, 1, 1], [], []>} : vector<16x128xbf16>, vector<128x128xbf16>, vector<16x128xf32> -> vector<16x128xf32>
    %4 = arith.truncf %3 : vector<16x128xf32> to vector<16x128xbf16>
    %c0_4 = arith.constant 0 : index
    %c0_5 = arith.constant 0 : index
    %c0_6 = arith.constant 0 : index
    %5 = vector.load %arg3[%c0_4, %c0_5, %c0_6] : memref<9x1x128xbf16, #tpu.memory_space<vmem>>, vector<1x1x128xbf16>
    %6 = vector.shape_cast %5 : vector<1x1x128xbf16> to vector<1x128xbf16>
    %7 = vector.broadcast %6 : vector<1x128xbf16> to vector<16x128xbf16>
    %8 = arith.addf %4, %7 : vector<16x128xbf16>
    %cst_7 = arith.constant 0.000000e+00 : bf16
    %9 = vector.broadcast %cst_7 : bf16 to vector<16x128xbf16>
    %10 = arith.maximumf %8, %9 : vector<16x128xbf16>
    %c1 = arith.constant 1 : index
    %c0_8 = arith.constant 0 : index
    %c0_9 = arith.constant 0 : index
    %11 = vector.load %arg2[%c1, %c0_8, %c0_9] : memref<9x128x128xbf16, #tpu.memory_space<vmem>>, vector<1x128x128xbf16>
    %12 = vector.shape_cast %11 : vector<1x128x128xbf16> to vector<128x128xbf16>
    %cst_10 = arith.constant dense<0.000000e+00> : vector<16x128xf32>
    %13 = tpu.matmul %10, %12, %cst_10 {dimension_numbers = #tpu.dot_dimension_numbers<[1], [0], [0], [1], [0, 0, 1, 1], [], []>} : vector<16x128xbf16>, vector<128x128xbf16>, vector<16x128xf32> -> vector<16x128xf32>
    %14 = arith.truncf %13 : vector<16x128xf32> to vector<16x128xbf16>
    %c1_11 = arith.constant 1 : index
    %c0_12 = arith.constant 0 : index
    %c0_13 = arith.constant 0 : index
    %15 = vector.load %arg3[%c1_11, %c0_12, %c0_13] : memref<9x1x128xbf16, #tpu.memory_space<vmem>>, vector<1x1x128xbf16>
    %16 = vector.shape_cast %15 : vector<1x1x128xbf16> to vector<1x128xbf16>
    %17 = vector.broadcast %16 : vector<1x128xbf16> to vector<16x128xbf16>
    %18 = arith.addf %14, %17 : vector<16x128xbf16>
    %cst_14 = arith.constant 0.000000e+00 : bf16
    %19 = vector.broadcast %cst_14 : bf16 to vector<16x128xbf16>
    %20 = arith.maximumf %18, %19 : vector<16x128xbf16>
    %c2 = arith.constant 2 : index
    %c0_15 = arith.constant 0 : index
    %c0_16 = arith.constant 0 : index
    %21 = vector.load %arg2[%c2, %c0_15, %c0_16] : memref<9x128x128xbf16, #tpu.memory_space<vmem>>, vector<1x128x128xbf16>
    %22 = vector.shape_cast %21 : vector<1x128x128xbf16> to vector<128x128xbf16>
    %cst_17 = arith.constant dense<0.000000e+00> : vector<16x128xf32>
    %23 = tpu.matmul %20, %22, %cst_17 {dimension_numbers = #tpu.dot_dimension_numbers<[1], [0], [0], [1], [0, 0, 1, 1], [], []>} : vector<16x128xbf16>, vector<128x128xbf16>, vector<16x128xf32> -> vector<16x128xf32>
    %24 = arith.truncf %23 : vector<16x128xf32> to vector<16x128xbf16>
    %c2_18 = arith.constant 2 : index
    %c0_19 = arith.constant 0 : index
    %c0_20 = arith.constant 0 : index
    %25 = vector.load %arg3[%c2_18, %c0_19, %c0_20] : memref<9x1x128xbf16, #tpu.memory_space<vmem>>, vector<1x1x128xbf16>
    %26 = vector.shape_cast %25 : vector<1x1x128xbf16> to vector<1x128xbf16>
    %27 = vector.broadcast %26 : vector<1x128xbf16> to vector<16x128xbf16>
    %28 = arith.addf %24, %27 : vector<16x128xbf16>
    %cst_21 = arith.constant 0.000000e+00 : bf16
    %29 = vector.broadcast %cst_21 : bf16 to vector<16x128xbf16>
    %30 = arith.maximumf %28, %29 : vector<16x128xbf16>
    %c3 = arith.constant 3 : index
    %c0_22 = arith.constant 0 : index
    %c0_23 = arith.constant 0 : index
    %31 = vector.load %arg2[%c3, %c0_22, %c0_23] : memref<9x128x128xbf16, #tpu.memory_space<vmem>>, vector<1x128x128xbf16>
    %32 = vector.shape_cast %31 : vector<1x128x128xbf16> to vector<128x128xbf16>
    %cst_24 = arith.constant dense<0.000000e+00> : vector<16x128xf32>
    %33 = tpu.matmul %30, %32, %cst_24 {dimension_numbers = #tpu.dot_dimension_numbers<[1], [0], [0], [1], [0, 0, 1, 1], [], []>} : vector<16x128xbf16>, vector<128x128xbf16>, vector<16x128xf32> -> vector<16x128xf32>
    %34 = arith.truncf %33 : vector<16x128xf32> to vector<16x128xbf16>
    %c3_25 = arith.constant 3 : index
    %c0_26 = arith.constant 0 : index
    %c0_27 = arith.constant 0 : index
    %35 = vector.load %arg3[%c3_25, %c0_26, %c0_27] : memref<9x1x128xbf16, #tpu.memory_space<vmem>>, vector<1x1x128xbf16>
    %36 = vector.shape_cast %35 : vector<1x1x128xbf16> to vector<1x128xbf16>
    %37 = vector.broadcast %36 : vector<1x128xbf16> to vector<16x128xbf16>
    %38 = arith.addf %34, %37 : vector<16x128xbf16>
    %cst_28 = arith.constant 0.000000e+00 : bf16
    %39 = vector.broadcast %cst_28 : bf16 to vector<16x128xbf16>
    %40 = arith.maximumf %38, %39 : vector<16x128xbf16>
    %c4 = arith.constant 4 : index
    %c0_29 = arith.constant 0 : index
    %c0_30 = arith.constant 0 : index
    %41 = vector.load %arg2[%c4, %c0_29, %c0_30] : memref<9x128x128xbf16, #tpu.memory_space<vmem>>, vector<1x128x128xbf16>
    %42 = vector.shape_cast %41 : vector<1x128x128xbf16> to vector<128x128xbf16>
    %cst_31 = arith.constant dense<0.000000e+00> : vector<16x128xf32>
    %43 = tpu.matmul %40, %42, %cst_31 {dimension_numbers = #tpu.dot_dimension_numbers<[1], [0], [0], [1], [0, 0, 1, 1], [], []>} : vector<16x128xbf16>, vector<128x128xbf16>, vector<16x128xf32> -> vector<16x128xf32>
    %44 = arith.truncf %43 : vector<16x128xf32> to vector<16x128xbf16>
    %c4_32 = arith.constant 4 : index
    %c0_33 = arith.constant 0 : index
    %c0_34 = arith.constant 0 : index
    %45 = vector.load %arg3[%c4_32, %c0_33, %c0_34] : memref<9x1x128xbf16, #tpu.memory_space<vmem>>, vector<1x1x128xbf16>
    %46 = vector.shape_cast %45 : vector<1x1x128xbf16> to vector<1x128xbf16>
    %47 = vector.broadcast %46 : vector<1x128xbf16> to vector<16x128xbf16>
    %48 = arith.addf %44, %47 : vector<16x128xbf16>
    %cst_35 = arith.constant 0.000000e+00 : bf16
    %49 = vector.broadcast %cst_35 : bf16 to vector<16x128xbf16>
    %50 = arith.maximumf %48, %49 : vector<16x128xbf16>
    %c5 = arith.constant 5 : index
    %c0_36 = arith.constant 0 : index
    %c0_37 = arith.constant 0 : index
    %51 = vector.load %arg2[%c5, %c0_36, %c0_37] : memref<9x128x128xbf16, #tpu.memory_space<vmem>>, vector<1x128x128xbf16>
    %52 = vector.shape_cast %51 : vector<1x128x128xbf16> to vector<128x128xbf16>
    %cst_38 = arith.constant dense<0.000000e+00> : vector<16x128xf32>
    %53 = tpu.matmul %50, %52, %cst_38 {dimension_numbers = #tpu.dot_dimension_numbers<[1], [0], [0], [1], [0, 0, 1, 1], [], []>} : vector<16x128xbf16>, vector<128x128xbf16>, vector<16x128xf32> -> vector<16x128xf32>
    %54 = arith.truncf %53 : vector<16x128xf32> to vector<16x128xbf16>
    %c5_39 = arith.constant 5 : index
    %c0_40 = arith.constant 0 : index
    %c0_41 = arith.constant 0 : index
    %55 = vector.load %arg3[%c5_39, %c0_40, %c0_41] : memref<9x1x128xbf16, #tpu.memory_space<vmem>>, vector<1x1x128xbf16>
    %56 = vector.shape_cast %55 : vector<1x1x128xbf16> to vector<1x128xbf16>
    %57 = vector.broadcast %56 : vector<1x128xbf16> to vector<16x128xbf16>
    %58 = arith.addf %54, %57 : vector<16x128xbf16>
    %cst_42 = arith.constant 0.000000e+00 : bf16
    %59 = vector.broadcast %cst_42 : bf16 to vector<16x128xbf16>
    %60 = arith.maximumf %58, %59 : vector<16x128xbf16>
    %c6 = arith.constant 6 : index
    %c0_43 = arith.constant 0 : index
    %c0_44 = arith.constant 0 : index
    %61 = vector.load %arg2[%c6, %c0_43, %c0_44] : memref<9x128x128xbf16, #tpu.memory_space<vmem>>, vector<1x128x128xbf16>
    %62 = vector.shape_cast %61 : vector<1x128x128xbf16> to vector<128x128xbf16>
    %cst_45 = arith.constant dense<0.000000e+00> : vector<16x128xf32>
    %63 = tpu.matmul %60, %62, %cst_45 {dimension_numbers = #tpu.dot_dimension_numbers<[1], [0], [0], [1], [0, 0, 1, 1], [], []>} : vector<16x128xbf16>, vector<128x128xbf16>, vector<16x128xf32> -> vector<16x128xf32>
    %64 = arith.truncf %63 : vector<16x128xf32> to vector<16x128xbf16>
    %c6_46 = arith.constant 6 : index
    %c0_47 = arith.constant 0 : index
    %c0_48 = arith.constant 0 : index
    %65 = vector.load %arg3[%c6_46, %c0_47, %c0_48] : memref<9x1x128xbf16, #tpu.memory_space<vmem>>, vector<1x1x128xbf16>
    %66 = vector.shape_cast %65 : vector<1x1x128xbf16> to vector<1x128xbf16>
    %67 = vector.broadcast %66 : vector<1x128xbf16> to vector<16x128xbf16>
    %68 = arith.addf %64, %67 : vector<16x128xbf16>
    %cst_49 = arith.constant 0.000000e+00 : bf16
    %69 = vector.broadcast %cst_49 : bf16 to vector<16x128xbf16>
    %70 = arith.maximumf %68, %69 : vector<16x128xbf16>
    %c7 = arith.constant 7 : index
    %c0_50 = arith.constant 0 : index
    %c0_51 = arith.constant 0 : index
    %71 = vector.load %arg2[%c7, %c0_50, %c0_51] : memref<9x128x128xbf16, #tpu.memory_space<vmem>>, vector<1x128x128xbf16>
    %72 = vector.shape_cast %71 : vector<1x128x128xbf16> to vector<128x128xbf16>
    %cst_52 = arith.constant dense<0.000000e+00> : vector<16x128xf32>
    %73 = tpu.matmul %70, %72, %cst_52 {dimension_numbers = #tpu.dot_dimension_numbers<[1], [0], [0], [1], [0, 0, 1, 1], [], []>} : vector<16x128xbf16>, vector<128x128xbf16>, vector<16x128xf32> -> vector<16x128xf32>
    %74 = arith.truncf %73 : vector<16x128xf32> to vector<16x128xbf16>
    %c7_53 = arith.constant 7 : index
    %c0_54 = arith.constant 0 : index
    %c0_55 = arith.constant 0 : index
    %75 = vector.load %arg3[%c7_53, %c0_54, %c0_55] : memref<9x1x128xbf16, #tpu.memory_space<vmem>>, vector<1x1x128xbf16>
    %76 = vector.shape_cast %75 : vector<1x1x128xbf16> to vector<1x128xbf16>
    %77 = vector.broadcast %76 : vector<1x128xbf16> to vector<16x128xbf16>
    %78 = arith.addf %74, %77 : vector<16x128xbf16>
    %cst_56 = arith.constant 0.000000e+00 : bf16
    %79 = vector.broadcast %cst_56 : bf16 to vector<16x128xbf16>
    %80 = arith.maximumf %78, %79 : vector<16x128xbf16>
    %c8 = arith.constant 8 : index
    %c0_57 = arith.constant 0 : index
    %c0_58 = arith.constant 0 : index
    %81 = vector.load %arg2[%c8, %c0_57, %c0_58] : memref<9x128x128xbf16, #tpu.memory_space<vmem>>, vector<1x128x128xbf16>
    %82 = vector.shape_cast %81 : vector<1x128x128xbf16> to vector<128x128xbf16>
    %cst_59 = arith.constant dense<0.000000e+00> : vector<16x128xf32>
    %83 = tpu.matmul %80, %82, %cst_59 {dimension_numbers = #tpu.dot_dimension_numbers<[1], [0], [0], [1], [0, 0, 1, 1], [], []>} : vector<16x128xbf16>, vector<128x128xbf16>, vector<16x128xf32> -> vector<16x128xf32>
    %84 = arith.truncf %83 : vector<16x128xf32> to vector<16x128xbf16>
    %c8_60 = arith.constant 8 : index
    %c0_61 = arith.constant 0 : index
    %c0_62 = arith.constant 0 : index
    %85 = vector.load %arg3[%c8_60, %c0_61, %c0_62] : memref<9x1x128xbf16, #tpu.memory_space<vmem>>, vector<1x1x128xbf16>
    %86 = vector.shape_cast %85 : vector<1x1x128xbf16> to vector<1x128xbf16>
    %87 = vector.broadcast %86 : vector<1x128xbf16> to vector<16x128xbf16>
    %88 = arith.addf %84, %87 : vector<16x128xbf16>
    %c0_63 = arith.constant 0 : index
    %c0_64 = arith.constant 0 : index
    %89 = vector.load %arg4[%c0_63, %c0_64] : memref<16x128xbf16, #tpu.memory_space<vmem>>, vector<16x128xbf16>
    tpu.vector_store %arg4[%c0_63, %c0_64], %88 {strides = array<i32>} : memref<16x128xbf16, #tpu.memory_space<vmem>>, vector<16x128xbf16>,
    return
  }
  func.func @transform_0(%arg0: i32) -> (i32, i32) {
    %c0_i32 = arith.constant 0 : i32
    %c0_i32_0 = arith.constant 0 : i32
    return %arg0, %c0_i32 : i32, i32
  }
  func.func @transform_1(%arg0: i32) -> (i32, i32, i32) {
    %c0_i32 = arith.constant 0 : i32
    %c0_i32_0 = arith.constant 0 : i32
    %c0_i32_1 = arith.constant 0 : i32
    %c0_i32_2 = arith.constant 0 : i32
    return %c0_i32, %c0_i32_0, %c0_i32_1 : i32, i32, i32
  }
  func.func @transform_2(%arg0: i32) -> (i32, i32, i32) {
    %c0_i32 = arith.constant 0 : i32
    %c0_i32_0 = arith.constant 0 : i32
    %c0_i32_1 = arith.constant 0 : i32
    %c0_i32_2 = arith.constant 0 : i32
    return %c0_i32, %c0_i32_0, %c0_i32_1 : i32, i32, i32
  }
  func.func @transform_3(%arg0: i32) -> (i32, i32) {
    %c0_i32 = arith.constant 0 : i32
    %c0_i32_0 = arith.constant 0 : i32
    return %arg0, %c0_i32 : i32, i32
  }
}

</mosaic_0001>

<bundles_post_ra>
// kernel: mlp_forward.1
= control target key start
LH: loop header
LB: loop body
LE: loop exit
PB: predicated region body
PF: predicated region fallthrough
CT: control target
= control target key end

     0   :  { %8 = vsyncpa [#allocation3], 0  ;;  %s1557_s12 = smov [#allocation2]   ;;  %s1740_s0 = inlined_call_operand.vmem [shape: bf16[16,128], index: 0, kind: input, shape index: {}]   ;;  %s1741_s1 = inlined_call_operand.hbm [shape: bf16[9,128,128], index: 1, kind: input, shape index: {}]   ;;  %s1742_s2 = inlined_call_operand.vmem [shape: bf16[9,1,128], index: 2, kind: input, shape index: {}]   ;;  %s1743_s3 = inlined_call_operand.vmem [shape: bf16[16,128], index: 3, kind: output, shape index: {}]  }
   0x1   :  { %s16_s13 = sshll.u32 %s1557_s12, 4  ;;  %s1533_s16 = scalar_lea.hbm %s1741_s1, 9216  ;;  %s17_s13 = int_to_ptr.vmem [resolvable:$true] %s16_s13 }
   0x2   :  { %p1534_p0 = scmp.ne.s32.totalorder %s1741_s1, %s1533_s16  ;;  %p1537_p1 = scmp.lt.u32.totalorder %s1533_s16, %s1741_s1 }
   0x4   :  { %p1539_p2 = pnand %p1537_p1, %p1534_p0 }
   0x6   :  { %1542 = shalt.err (!%p1539_p2)
}
   0x7   :  { %s1543_s21 = scalar_lea.vmem %s17_s13, 9216  ;;  %p1548_p4 = scmp.lt.s32.totalorder %s17_s13, %s17_s13 }
   0x8   :  { %p1544_p3 = scmp.ne.s32.totalorder %s17_s13, %s1543_s21  ;;  %p1549_p5 = scmp.lt.s32.totalorder %s1543_s21, %s1543_s21 }
   0xa   :  { %p1550_p6 = por %p1549_p5, %p1548_p4 }
   0xc   :  { %p1551_p7 = pnand %p1550_p6, %p1544_p3 }
   0xe   :  { %1554 = shalt.err (!%p1551_p7)
}
   0xf   :  { %s1558_s22 = smov 64   ;;  %s1559_s23 = smov 4  }
  0x10   :  { %22 = dma.hbm_to_vmem [thread:$0]  %s1741_s1, 9216, %s17_s13, [#allocation3], %s1558_s22, %s1558_s22, %s1559_s23  }
  0x11   :  { %1555 = dma.done.wait [#allocation3], 9216  }
  0x12   :  { %1556 = vsyncadd [#allocation3], 4294958080  ;;  %v1560_v0 = vmov 0.0   ;;  %vm1561_vm0 = vmmov 0   ;;  %v1460_v1 = vld [vmem:[#allocation2] sm:$0xff]   ;;  %v1461_v2 = vld [vmem:[#allocation2 + $0x8] sm:$0xff]   ;;  %v147_v24 = vlaneseq }
  0x13   :  { %1274 = vmatprep.subr.bf16.mxu0 %v1560_v0  ;;  %1290 = vmatprep.mubr.msk.bf16.mxu0 %vm1561_vm0, %v1560_v0  ;;  %v1462_v3 = vld [vmem:[#allocation2 + $0x10] sm:$0xff]   ;;  %v1469_v4 = vld [vmem:[#allocation2 + $0x40] sm:$0xff]   ;;  %v1463_v5 = vld [vmem:[#allocation2 + $0x18] sm:$0xff]   ;;  %v1562_v36 = vmov 0  }
  0x14   :  { %1294 = vmatprep.subr.bf16.mxu1 %v1560_v0  ;;  %1310 = vmatprep.mubr.msk.bf16.mxu1 %vm1561_vm0, %v1560_v0  ;;  %v1470_v6 = vld [vmem:[#allocation2 + $0x48] sm:$0xff]   ;;  %v1464_v7 = vld [vmem:[#allocation2 + $0x20] sm:$0xff]   ;;  %v1471_v8 = vld [vmem:[#allocation2 + $0x50] sm:$0xff]   ;;  %v148_v25 = vshrl.u32 %v147_v24, 7 }
  0x15   :  { %1275 = vmatpush3.bf16.msra.mxu0 %v1460_v1  ;;  %1295 = vmatpush3.bf16.msra.mxu1 %v1469_v4  ;;  %v1465_v9 = vld [vmem:[#allocation2 + $0x28] sm:$0xff]   ;;  %v1472_v10 = vld [vmem:[#allocation2 + $0x58] sm:$0xff]   ;;  %v1466_v11 = vld [vmem:[#allocation2 + $0x30] sm:$0xff]  }
  0x16   :  { %1276 = vmatprep.subr.bf16.mxu0 %v1560_v0  ;;  %1296 = vmatprep.subr.bf16.mxu1 %v1560_v0  ;;  %v1473_v12 = vld [vmem:[#allocation2 + $0x60] sm:$0xff]   ;;  %v1467_v13 = vld [vmem:[#allocation2 + $0x38] sm:$0xff]   ;;  %v1474_v14 = vld [vmem:[#allocation2 + $0x68] sm:$0xff]   ;;  %v1631_v28 = vsub.s32 0, %v148_v25 }
  0x17   :  { %v1468_v15 = vld [vmem:[%s1740_s0] sm:$0xff]   ;;  %v1475_v16 = vld [vmem:[#allocation2 + $0x70] sm:$0xff]   ;;  %v1476_v17 = vld [vmem:[#allocation2 + $0x78] sm:$0xff]  }
  0x18   :  { %v1477_v18 = vld [vmem:[#allocation2 + $0x80] sm:$0xff]   ;;  %v1478_v19 = vld [vmem:[#allocation2 + $0x88] sm:$0xff]   ;;  %v1479_v20 = vld [vmem:[#allocation2 + $0x90] sm:$0xff]  }
  0x19   :  { %1277 = vmatpush3.bf16.msra.mxu0 %v1461_v2  ;;  %1297 = vmatpush3.bf16.msra.mxu1 %v1470_v6  ;;  %v1480_v21 = vld [vmem:[#allocation2 + $0x98] sm:$0xff]   ;;  %v1481_v22 = vld [vmem:[#allocation2 + $0xa0] sm:$0xff]   ;;  %v1482_v23 = vld [vmem:[#allocation2 + $0xa8] sm:$0xff]  }
  0x1a   :  { %1278 = vmatprep.subr.bf16.mxu0 %v1560_v0  ;;  %1298 = vmatprep.subr.bf16.mxu1 %v1560_v0  ;;  %v143_v26 = vld [vmem:[%s1742_s2] sm:$0x1]  ;;  %v1483_v38 = vld [vmem:[#allocation2 + $0xb0] sm:$0xff]   ;;  %v1484_v39 = vld [vmem:[#allocation2 + $0xb8] sm:$0xff]  }
  0x1b   :  { %v145_v27 = vpack.i.b16 %v143_v26, %v143_v26  ;;  %v1485_v40 = vld [vmem:[#allocation2 + $0xc0] sm:$0xff]   ;;  %v1486_v41 = vld [vmem:[#allocation2 + $0xc8] sm:$0xff]   ;;  %v1487_v42 = vld [vmem:[#allocation2 + $0xd0] sm:$0xff]  }
  0x1c   :  { %v1488_v43 = vld [vmem:[#allocation2 + $0xd8] sm:$0xff]   ;;  %v1489_v44 = vld [vmem:[#allocation2 + $0xe0] sm:$0xff]   ;;  %v1490_v45 = vld [vmem:[#allocation2 + $0xe8] sm:$0xff]  }
  0x1d   :  { %1279 = vmatpush3.bf16.msra.mxu0 %v1462_v3  ;;  %1299 = vmatpush3.bf16.msra.mxu1 %v1471_v8  ;;  %v150_v31 = vrot.slane %v145_v27, %v1631_v28  ;;  %v1127_v46 = vld [vmem:[%s1742_s2 + $0x1] sm:$0x1]  ;;  %v1491_v56 = vld [vmem:[#allocation2 + $0xf0] sm:$0xff]   ;;  %v1492_v57 = vld [vmem:[#allocation2 + $0xf8] sm:$0xff]  }
  0x1e   :  { %1280 = vmatprep.subr.bf16.mxu0 %v1560_v0  ;;  %1300 = vmatprep.subr.bf16.mxu1 %v1560_v0  ;;  %v263_v47 = vpack.i.b16 %v1127_v46, %v1127_v46  ;;  %v1493_v58 = vld [vmem:[#allocation2 + $0x100] sm:$0xff]   ;;  %v1494_v59 = vld [vmem:[#allocation2 + $0x108] sm:$0xff]   ;;  %v1495_v60 = vld [vmem:[#allocation2 + $0x110] sm:$0xff]  }
  0x1f   :  { %v1496_v61 = vld [vmem:[#allocation2 + $0x118] sm:$0xff]   ;;  %v1497_v62 = vld [vmem:[#allocation2 + $0x120] sm:$0xff]   ;;  %v1498_v63 = vld [vmem:[#allocation2 + $0x128] sm:$0xff]  }
  0x20   :  { %v268_v50 = vrot.slane %v263_v47, %v1631_v28  ;;  %v1136_v1 = vld [vmem:[%s1742_s2 + $0x2] sm:$0x1] }
  0x21   :  { %1281 = vmatpush3.bf16.msra.mxu0 %v1463_v5  ;;  %1301 = vmatpush3.bf16.msra.mxu1 %v1472_v10  ;;  %v381_v2 = vpack.i.b16 %v1136_v1, %v1136_v1 }
  0x22   :  { %1282 = vmatprep.subr.bf16.mxu0 %v1560_v0  ;;  %1302 = vmatprep.subr.bf16.mxu1 %v1560_v0 }
  0x23   :  { %v386_v5 = vrot.slane %v381_v2, %v1631_v28 }
  0x25   :  { %1283 = vmatpush3.bf16.msra.mxu0 %v1464_v7  ;;  %1303 = vmatpush3.bf16.msra.mxu1 %v1473_v12  ;;  %v1500_v12 = vld [vmem:[#allocation2 + $0x138] sm:$0xff]  }
  0x26   :  { %1284 = vmatprep.subr.bf16.mxu0 %v1560_v0  ;;  %1304 = vmatprep.subr.bf16.mxu1 %v1560_v0 }
  0x29   :  { %1285 = vmatpush3.bf16.msra.mxu0 %v1465_v9  ;;  %1305 = vmatpush3.bf16.msra.mxu1 %v1474_v14  ;;  %v1502_v14 = vld [vmem:[#allocation2 + $0x148] sm:$0xff]  }
  0x2a   :  { %1286 = vmatprep.subr.bf16.mxu0 %v1560_v0  ;;  %1306 = vmatprep.subr.bf16.mxu1 %v1560_v0 }
  0x2d   :  { %1287 = vmatpush3.bf16.msra.mxu0 %v1466_v11  ;;  %1307 = vmatpush3.bf16.msra.mxu1 %v1475_v16  ;;  %v1499_v11 = vld [vmem:[#allocation2 + $0x130] sm:$0xff]   ;;  %v1504_v16 = vld [vmem:[#allocation2 + $0x158] sm:$0xff]  }
  0x2e   :  { %1288 = vmatprep.subr.bf16.mxu0 %v1560_v0  ;;  %1308 = vmatprep.subr.bf16.mxu1 %v1560_v0 }
  0x31   :  { %1289 = vmatpush3.bf16.msra.mxu0 %v1467_v13  ;;  %1309 = vmatpush3.bf16.msra.mxu1 %v1476_v17  ;;  %v1501_v13 = vld [vmem:[#allocation2 + $0x140] sm:$0xff]  }
  0x32   :  { %1314 = vmatprep.subr.bf16.mxu0 %v1560_v0  ;;  %1334 = vmatprep.subr.bf16.mxu1 %v1560_v0  ;;  %v1505_v17 = vld [vmem:[#allocation2 + $0x160] sm:$0xff]  }
  0x34   :  { %1291 = vmatmul.mubr.bf16.vlgmr.msra.gmra.mrb[0].mxu0 %v1468_v15  ;;  %v1503_v15 = vld [vmem:[#allocation2 + $0x150] sm:$0xff]  }
  0x35   :  { %1330 = vmatprep.mubr.msk.bf16.mxu0 %vm1561_vm0, %v1560_v0  ;;  %1315 = vmatpush3.bf16.msra.mxu0 %v1477_v18  ;;  %v1506_v18 = vld [vmem:[#allocation2 + $0x168] sm:$0xff]  }
  0x36   :  { %1316 = vmatprep.subr.bf16.mxu0 %v1560_v0 }
  0x39   :  { %1317 = vmatpush3.bf16.msra.mxu0 %v1478_v19  ;;  %v1145_v19 = vld [vmem:[%s1742_s2 + $0x3] sm:$0x1] }
  0x3a   :  { %1318 = vmatprep.subr.bf16.mxu0 %v1560_v0 }
  0x3d   :  { %1319 = vmatpush3.bf16.msra.mxu0 %v1479_v20  ;;  %v499_v20 = vpack.i.b16 %v1145_v19, %v1145_v19 }
  0x3e   :  { %1320 = vmatprep.subr.bf16.mxu0 %v1560_v0 }
  0x41   :  { %1321 = vmatpush3.bf16.msra.mxu0 %v1480_v21 }
  0x42   :  { %1322 = vmatprep.subr.bf16.mxu0 %v1560_v0 }
  0x45   :  { %1323 = vmatpush3.bf16.msra.mxu0 %v1481_v22 }
  0x46   :  { %1324 = vmatprep.subr.bf16.mxu0 %v1560_v0 }
  0x49   :  { %1325 = vmatpush3.bf16.msra.mxu0 %v1482_v23  ;;  %v504_v23 = vrot.slane %v499_v20, %v1631_v28 }
  0x4a   :  { %1326 = vmatprep.subr.bf16.mxu0 %v1560_v0 }
  0x4d   :  { %1327 = vmatpush3.bf16.msra.mxu0 %v1483_v38  ;;  %v1514_v38 = vld [vmem:[#allocation2 + $0x1a8] sm:$0xff]  }
  0x4e   :  { %1328 = vmatprep.subr.bf16.mxu0 %v1560_v0 }
  0x51   :  { %1329 = vmatpush3.bf16.msra.mxu0 %v1484_v39  ;;  %v1154_v39 = vld [vmem:[%s1742_s2 + $0x4] sm:$0x1] }
  0x52   :  { %1354 = vmatprep.subr.bf16.mxu0 %v1560_v0 }
 0x107   :  { %v135_v29 = vpop.f32.mrb[0].mxu0 }
 0x108   :  { %v1292_v30 = vpop.f32.mrb[1].mxu0 }
 0x109   :  { %v138_v32 = vpop.f32.mrb[2].mxu0  ;;  %v1507_v30 = vld [vmem:[#allocation2 + $0x170] sm:$0xff]  }
 0x10a   :  { %v142_v33 = vpack.c.bf16 %v138_v32, %v135_v29  ;;  %v1293_v34 = vpop.f32.mrb[3].mxu0  ;;  %v1509_v32 = vld [vmem:[#allocation2 + $0x180] sm:$0xff]  }
 0x10b   :  { %v1511_v34 = vld [vmem:[#allocation2 + $0x190] sm:$0xff]  }
 0x10c   :  { %v151_v35 = vadd.bf16 %v150_v31, %v142_v33  ;;  %v1508_v31 = vld [vmem:[#allocation2 + $0x178] sm:$0xff]   ;;  %v1510_v33 = vld [vmem:[#allocation2 + $0x188] sm:$0xff]  }
 0x10e   :  { %v152_v37 = vmax.bf16 %v1562_v36, %v151_v35  ;;  %v1512_v35 = vld [vmem:[#allocation2 + $0x198] sm:$0xff]  }
 0x110   :  { %1311 = vmatmul.mubr.bf16.vlgmr.msra.gmra.mrb[0].mxu1 %v152_v37  ;;  %v1513_v37 = vld [vmem:[#allocation2 + $0x1a0] sm:$0xff]  }
 0x111   :  { %1350 = vmatprep.mubr.msk.bf16.mxu1 %vm1561_vm0, %v1560_v0  ;;  %1335 = vmatpush3.bf16.msra.mxu1 %v1485_v40  ;;  %v617_v40 = vpack.i.b16 %v1154_v39, %v1154_v39 }
 0x112   :  { %1336 = vmatprep.subr.bf16.mxu1 %v1560_v0 }
 0x115   :  { %1337 = vmatpush3.bf16.msra.mxu1 %v1486_v41 }
 0x116   :  { %1338 = vmatprep.subr.bf16.mxu1 %v1560_v0 }
 0x119   :  { %1339 = vmatpush3.bf16.msra.mxu1 %v1487_v42 }
 0x11a   :  { %1340 = vmatprep.subr.bf16.mxu1 %v1560_v0 }
 0x11d   :  { %1341 = vmatpush3.bf16.msra.mxu1 %v1488_v43  ;;  %v622_v43 = vrot.slane %v617_v40, %v1631_v28 }
 0x11e   :  { %1342 = vmatprep.subr.bf16.mxu1 %v1560_v0 }
 0x121   :  { %1343 = vmatpush3.bf16.msra.mxu1 %v1489_v44 }
 0x122   :  { %1344 = vmatprep.subr.bf16.mxu1 %v1560_v0 }
 0x125   :  { %1345 = vmatpush3.bf16.msra.mxu1 %v1490_v45 }
 0x126   :  { %1346 = vmatprep.subr.bf16.mxu1 %v1560_v0 }
 0x129   :  { %1347 = vmatpush3.bf16.msra.mxu1 %v1491_v56  ;;  %v1522_v56 = vld [vmem:[#allocation2 + $0x1e8] sm:$0xff]  }
 0x12a   :  { %1348 = vmatprep.subr.bf16.mxu1 %v1560_v0 }
 0x12d   :  { %1349 = vmatpush3.bf16.msra.mxu1 %v1492_v57  ;;  %v1163_v57 = vld [vmem:[%s1742_s2 + $0x5] sm:$0x1] }
 0x12e   :  { %1374 = vmatprep.subr.bf16.mxu1 %v1560_v0 }
 0x1e3   :  { %v252_v48 = vpop.f32.mrb[0].mxu1 }
 0x1e4   :  { %v1312_v49 = vpop.f32.mrb[1].mxu1 }
 0x1e5   :  { %v255_v51 = vpop.f32.mrb[2].mxu1  ;;  %v1515_v49 = vld [vmem:[#allocation2 + $0x1b0] sm:$0xff]  }
 0x1e6   :  { %v259_v52 = vpack.c.bf16 %v255_v51, %v252_v48  ;;  %v1313_v53 = vpop.f32.mrb[3].mxu1  ;;  %v1517_v51 = vld [vmem:[#allocation2 + $0x1c0] sm:$0xff]  }
 0x1e7   :  { %v1519_v53 = vld [vmem:[#allocation2 + $0x1d0] sm:$0xff]  }
 0x1e8   :  { %v269_v54 = vadd.bf16 %v268_v50, %v259_v52  ;;  %v1516_v50 = vld [vmem:[#allocation2 + $0x1b8] sm:$0xff]   ;;  %v1518_v52 = vld [vmem:[#allocation2 + $0x1c8] sm:$0xff]  }
 0x1ea   :  { %v270_v55 = vmax.bf16 %v1562_v36, %v269_v54  ;;  %v1520_v54 = vld [vmem:[#allocation2 + $0x1d8] sm:$0xff]  }
 0x1ec   :  { %1331 = vmatmul.mubr.bf16.vlgmr.msra.gmra.mrb[4].mxu0 %v270_v55  ;;  %v1521_v55 = vld [vmem:[#allocation2 + $0x1e0] sm:$0xff]  }
 0x1ed   :  { %1370 = vmatprep.mubr.msk.bf16.mxu0 %vm1561_vm0, %v1560_v0  ;;  %1355 = vmatpush3.bf16.msra.mxu0 %v1493_v58  ;;  %v735_v58 = vpack.i.b16 %v1163_v57, %v1163_v57 }
 0x1ee   :  { %1356 = vmatprep.subr.bf16.mxu0 %v1560_v0 }
 0x1f1   :  { %1357 = vmatpush3.bf16.msra.mxu0 %v1494_v59 }
 0x1f2   :  { %1358 = vmatprep.subr.bf16.mxu0 %v1560_v0 }
 0x1f5   :  { %1359 = vmatpush3.bf16.msra.mxu0 %v1495_v60 }
 0x1f6   :  { %1360 = vmatprep.subr.bf16.mxu0 %v1560_v0 }
 0x1f9   :  { %1361 = vmatpush3.bf16.msra.mxu0 %v1496_v61  ;;  %v740_v61 = vrot.slane %v735_v58, %v1631_v28 }
 0x1fa   :  { %1362 = vmatprep.subr.bf16.mxu0 %v1560_v0 }
 0x1fd   :  { %1363 = vmatpush3.bf16.msra.mxu0 %v1497_v62 }
 0x1fe   :  { %1364 = vmatprep.subr.bf16.mxu0 %v1560_v0 }
 0x201   :  { %1365 = vmatpush3.bf16.msra.mxu0 %v1498_v63 }
 0x202   :  { %1366 = vmatprep.subr.bf16.mxu0 %v1560_v0 }
 0x205   :  { %1367 = vmatpush3.bf16.msra.mxu0 %v1499_v11  ;;  %v1530_v11 = vld [vmem:[#allocation2 + $0x228] sm:$0xff]  }
 0x206   :  { %1368 = vmatprep.subr.bf16.mxu0 %v1560_v0 }
 0x209   :  { %1369 = vmatpush3.bf16.msra.mxu0 %v1500_v12  ;;  %v1172_v12 = vld [vmem:[%s1742_s2 + $0x6] sm:$0x1] }
 0x20a   :  { %1394 = vmatprep.subr.bf16.mxu0 %v1560_v0 }
 0x2bf   :  { %v370_v3 = vpop.f32.mrb[4].mxu0 }
 0x2c0   :  { %v1332_v4 = vpop.f32.mrb[5].mxu0 }
 0x2c1   :  { %v373_v6 = vpop.f32.mrb[6].mxu0  ;;  %v1523_v4 = vld [vmem:[#allocation2 + $0x1f0] sm:$0xff]  }
 0x2c2   :  { %v377_v7 = vpack.c.bf16 %v373_v6, %v370_v3  ;;  %v1333_v8 = vpop.f32.mrb[7].mxu0  ;;  %v1525_v6 = vld [vmem:[#allocation2 + $0x200] sm:$0xff]  }
 0x2c3   :  { %v1527_v8 = vld [vmem:[#allocation2 + $0x210] sm:$0xff]  }
 0x2c4   :  { %v387_v9 = vadd.bf16 %v386_v5, %v377_v7  ;;  %v1524_v5 = vld [vmem:[#allocation2 + $0x1f8] sm:$0xff]   ;;  %v1526_v7 = vld [vmem:[#allocation2 + $0x208] sm:$0xff]  }
 0x2c6   :  { %v388_v10 = vmax.bf16 %v1562_v36, %v387_v9  ;;  %v1528_v9 = vld [vmem:[#allocation2 + $0x218] sm:$0xff]  }
 0x2c8   :  { %1351 = vmatmul.mubr.bf16.vlgmr.msra.gmra.mrb[4].mxu1 %v388_v10  ;;  %v1529_v10 = vld [vmem:[#allocation2 + $0x220] sm:$0xff]  }
 0x2c9   :  { %1390 = vmatprep.mubr.msk.bf16.mxu1 %vm1561_vm0, %v1560_v0  ;;  %1375 = vmatpush3.bf16.msra.mxu1 %v1501_v13  ;;  %v853_v13 = vpack.i.b16 %v1172_v12, %v1172_v12 }
 0x2ca   :  { %1376 = vmatprep.subr.bf16.mxu1 %v1560_v0 }
 0x2cd   :  { %1377 = vmatpush3.bf16.msra.mxu1 %v1502_v14 }
 0x2ce   :  { %1378 = vmatprep.subr.bf16.mxu1 %v1560_v0 }
 0x2d1   :  { %1379 = vmatpush3.bf16.msra.mxu1 %v1503_v15 }
 0x2d2   :  { %1380 = vmatprep.subr.bf16.mxu1 %v1560_v0 }
 0x2d5   :  { %1381 = vmatpush3.bf16.msra.mxu1 %v1504_v16  ;;  %v858_v16 = vrot.slane %v853_v13, %v1631_v28 }
 0x2d6   :  { %1382 = vmatprep.subr.bf16.mxu1 %v1560_v0 }
 0x2d9   :  { %1383 = vmatpush3.bf16.msra.mxu1 %v1505_v17 }
 0x2da   :  { %1384 = vmatprep.subr.bf16.mxu1 %v1560_v0 }
 0x2dd   :  { %1385 = vmatpush3.bf16.msra.mxu1 %v1506_v18 }
 0x2de   :  { %1386 = vmatprep.subr.bf16.mxu1 %v1560_v0 }
 0x2e1   :  { %1387 = vmatpush3.bf16.msra.mxu1 %v1507_v30 }
 0x2e2   :  { %1388 = vmatprep.subr.bf16.mxu1 %v1560_v0 }
 0x2e5   :  { %1389 = vmatpush3.bf16.msra.mxu1 %v1508_v31 }
 0x2e6   :  { %1414 = vmatprep.subr.bf16.mxu1 %v1560_v0 }
 0x39b   :  { %v488_v21 = vpop.f32.mrb[4].mxu1 }
 0x39c   :  { %v1352_v22 = vpop.f32.mrb[5].mxu1 }
 0x39d   :  { %v491_v24 = vpop.f32.mrb[6].mxu1  ;;  %v1531_v22 = vld [vmem:[#allocation2 + $0x230] sm:$0xff]  }
 0x39e   :  { %v495_v25 = vpack.c.bf16 %v491_v24, %v488_v21  ;;  %v1353_v26 = vpop.f32.mrb[7].mxu1  ;;  %v1181_v24 = vld [vmem:[%s1742_s2 + $0x7] sm:$0x1] }
 0x3a0   :  { %v505_v27 = vadd.bf16 %v504_v23, %v495_v25  ;;  %v1532_v23 = vld [vmem:[#allocation2 + $0x238] sm:$0xff]   ;;  %v971_v25 = vpack.i.b16 %v1181_v24, %v1181_v24 }
 0x3a2   :  { %v506_v29 = vmax.bf16 %v1562_v36, %v505_v27 }
 0x3a4   :  { %1371 = vmatmul.mubr.bf16.vlgmr.msra.gmra.mrb[8].mxu0 %v506_v29  ;;  %v976_v29 = vrot.slane %v971_v25, %v1631_v28 }
 0x3a5   :  { %1410 = vmatprep.mubr.msk.bf16.mxu0 %vm1561_vm0, %v1560_v0  ;;  %1395 = vmatpush3.bf16.msra.mxu0 %v1509_v32 }
 0x3a6   :  { %1396 = vmatprep.subr.bf16.mxu0 %v1560_v0 }
 0x3a9   :  { %1397 = vmatpush3.bf16.msra.mxu0 %v1510_v33 }
 0x3aa   :  { %1398 = vmatprep.subr.bf16.mxu0 %v1560_v0 }
 0x3ad   :  { %1399 = vmatpush3.bf16.msra.mxu0 %v1511_v34 }
 0x3ae   :  { %1400 = vmatprep.subr.bf16.mxu0 %v1560_v0 }
 0x3b1   :  { %1401 = vmatpush3.bf16.msra.mxu0 %v1512_v35 }
 0x3b2   :  { %1402 = vmatprep.subr.bf16.mxu0 %v1560_v0 }
 0x3b5   :  { %1403 = vmatpush3.bf16.msra.mxu0 %v1513_v37 }
 0x3b6   :  { %1404 = vmatprep.subr.bf16.mxu0 %v1560_v0 }
 0x3b9   :  { %1405 = vmatpush3.bf16.msra.mxu0 %v1514_v38 }
 0x3ba   :  { %1406 = vmatprep.subr.bf16.mxu0 %v1560_v0 }
 0x3bd   :  { %1407 = vmatpush3.bf16.msra.mxu0 %v1515_v49 }
 0x3be   :  { %1408 = vmatprep.subr.bf16.mxu0 %v1560_v0 }
 0x3c1   :  { %1409 = vmatpush3.bf16.msra.mxu0 %v1516_v50 }
 0x3c2   :  { %1434 = vmatprep.subr.bf16.mxu0 %v1560_v0 }
 0x477   :  { %v606_v41 = vpop.f32.mrb[8].mxu0 }
 0x478   :  { %v1372_v42 = vpop.f32.mrb[9].mxu0 }
 0x479   :  { %v609_v44 = vpop.f32.mrb[10].mxu0 }
 0x47a   :  { %v613_v45 = vpack.c.bf16 %v609_v44, %v606_v41  ;;  %v1373_v46 = vpop.f32.mrb[11].mxu0 }
 0x47c   :  { %v623_v47 = vadd.bf16 %v622_v43, %v613_v45 }
 0x47e   :  { %v624_v48 = vmax.bf16 %v1562_v36, %v623_v47 }
 0x480   :  { %1391 = vmatmul.mubr.bf16.vlgmr.msra.gmra.mrb[8].mxu1 %v624_v48 }
 0x481   :  { %1430 = vmatprep.mubr.msk.bf16.mxu1 %vm1561_vm0, %v1560_v0  ;;  %1415 = vmatpush3.bf16.msra.mxu1 %v1517_v51 }
 0x482   :  { %1416 = vmatprep.subr.bf16.mxu1 %v1560_v0 }
 0x485   :  { %1417 = vmatpush3.bf16.msra.mxu1 %v1518_v52 }
 0x486   :  { %1418 = vmatprep.subr.bf16.mxu1 %v1560_v0 }
 0x489   :  { %1419 = vmatpush3.bf16.msra.mxu1 %v1519_v53 }
 0x48a   :  { %1420 = vmatprep.subr.bf16.mxu1 %v1560_v0 }
 0x48d   :  { %1421 = vmatpush3.bf16.msra.mxu1 %v1520_v54 }
 0x48e   :  { %1422 = vmatprep.subr.bf16.mxu1 %v1560_v0 }
 0x491   :  { %1423 = vmatpush3.bf16.msra.mxu1 %v1521_v55 }
 0x492   :  { %1424 = vmatprep.subr.bf16.mxu1 %v1560_v0 }
 0x495   :  { %1425 = vmatpush3.bf16.msra.mxu1 %v1522_v56 }
 0x496   :  { %1426 = vmatprep.subr.bf16.mxu1 %v1560_v0 }
 0x499   :  { %1427 = vmatpush3.bf16.msra.mxu1 %v1523_v4 }
 0x49a   :  { %1428 = vmatprep.subr.bf16.mxu1 %v1560_v0 }
 0x49d   :  { %1429 = vmatpush3.bf16.msra.mxu1 %v1524_v5 }
 0x553   :  { %v724_v59 = vpop.f32.mrb[8].mxu1 }
 0x554   :  { %v1392_v60 = vpop.f32.mrb[9].mxu1 }
 0x555   :  { %v727_v62 = vpop.f32.mrb[10].mxu1 }
 0x556   :  { %v731_v63 = vpack.c.bf16 %v727_v62, %v724_v59  ;;  %v1393_v1 = vpop.f32.mrb[11].mxu1 }
 0x558   :  { %v741_v2 = vadd.bf16 %v740_v61, %v731_v63 }
 0x55a   :  { %v742_v3 = vmax.bf16 %v1562_v36, %v741_v2 }
 0x55c   :  { %1411 = vmatmul.mubr.bf16.vlgmr.msra.gmra.mrb[12].mxu0 %v742_v3 }
 0x55d   :  { %1450 = vmatprep.mubr.msk.bf16.mxu0 %vm1561_vm0, %v1560_v0  ;;  %1435 = vmatpush3.bf16.msra.mxu0 %v1525_v6 }
 0x55e   :  { %1436 = vmatprep.subr.bf16.mxu0 %v1560_v0 }
 0x561   :  { %1437 = vmatpush3.bf16.msra.mxu0 %v1526_v7 }
 0x562   :  { %1438 = vmatprep.subr.bf16.mxu0 %v1560_v0 }
 0x565   :  { %1439 = vmatpush3.bf16.msra.mxu0 %v1527_v8 }
 0x566   :  { %1440 = vmatprep.subr.bf16.mxu0 %v1560_v0 }
 0x569   :  { %1441 = vmatpush3.bf16.msra.mxu0 %v1528_v9 }
 0x56a   :  { %1442 = vmatprep.subr.bf16.mxu0 %v1560_v0 }
 0x56d   :  { %1443 = vmatpush3.bf16.msra.mxu0 %v1529_v10 }
 0x56e   :  { %1444 = vmatprep.subr.bf16.mxu0 %v1560_v0 }
 0x571   :  { %1445 = vmatpush3.bf16.msra.mxu0 %v1530_v11 }
 0x572   :  { %1446 = vmatprep.subr.bf16.mxu0 %v1560_v0 }
 0x575   :  { %1447 = vmatpush3.bf16.msra.mxu0 %v1531_v22 }
 0x576   :  { %1448 = vmatprep.subr.bf16.mxu0 %v1560_v0  ;;  %v1190_v0 = vld [vmem:[%s1742_s2 + $0x8] sm:$0x1] }
 0x577   :  { %v1089_v35 = vpack.i.b16 %v1190_v0, %v1190_v0 }
 0x579   :  { %1449 = vmatpush3.bf16.msra.mxu0 %v1532_v23  ;;  %v1094_v39 = vrot.slane %v1089_v35, %v1631_v28 }
 0x62f   :  { %v842_v14 = vpop.f32.mrb[12].mxu0 }
 0x630   :  { %v1412_v15 = vpop.f32.mrb[13].mxu0 }
 0x631   :  { %v845_v17 = vpop.f32.mrb[14].mxu0 }
 0x632   :  { %v849_v18 = vpack.c.bf16 %v845_v17, %v842_v14  ;;  %v1413_v19 = vpop.f32.mrb[15].mxu0 }
 0x634   :  { %v859_v20 = vadd.bf16 %v858_v16, %v849_v18 }
 0x636   :  { %v860_v21 = vmax.bf16 %v1562_v36, %v859_v20 }
 0x638   :  { %1431 = vmatmul.mubr.bf16.vlgmr.msra.gmra.mrb[12].mxu1 %v860_v21 }
 0x70b   :  { %v960_v26 = vpop.f32.mrb[12].mxu1 }
 0x70c   :  { %v1432_v27 = vpop.f32.mrb[13].mxu1 }
 0x70d   :  { %v963_v30 = vpop.f32.mrb[14].mxu1 }
 0x70e   :  { %v967_v31 = vpack.c.bf16 %v963_v30, %v960_v26  ;;  %v1433_v32 = vpop.f32.mrb[15].mxu1 }
 0x710   :  { %v977_v33 = vadd.bf16 %v976_v29, %v967_v31 }
 0x712   :  { %v978_v34 = vmax.bf16 %v1562_v36, %v977_v33 }
 0x714   :  { %1451 = vmatmul.mubr.bf16.vlgmr.msra.gmra.mrb[16].mxu0 %v978_v34 }
 0x7e7   :  { %v1078_v37 = vpop.f32.mrb[16].mxu0 }
 0x7e8   :  { %v1452_v38 = vpop.f32.mrb[17].mxu0 }
 0x7e9   :  { %v1081_v40 = vpop.f32.mrb[18].mxu0 }
 0x7ea   :  { %v1085_v41 = vpack.c.bf16 %v1081_v40, %v1078_v37  ;;  %v1453_v42 = vpop.f32.mrb[19].mxu0 }
 0x7ec   :  { %v1095_v43 = vadd.bf16 %v1094_v39, %v1085_v41 }
 0x7ee   :  { %v1191_v44 = vcombine.low %v1095_v43, %v1095_v43  ;;  %v1192_v45 = vcombine.high %v1095_v43, %v1095_v43 }
 0x7f0   :  { %1103 = vst [vmem:[%s1743_s3] sm:$0xf] %v1191_v44  ;;  %1104 = vst [vmem:[%s1743_s3 + $0x4] sm:$0xf] %v1192_v45 }
 0x7f1   :  { %1109 = vsyncpa [#allocation3], 1 }

</bundles_post_ra>
